<compile_context>
chip_gen: v5e
topology: v5e:2x2
jax: 0.10.0
libtpu: 0.0.40
codegen_flags: <defaults>
</compile_context>

<pallas_src>
import functools

import numpy as np

import jax
import jax.numpy as jnp
from jax.experimental import pallas as pl
from jax.experimental.pallas import tpu as pltpu

_BN_EPS = 1e-5


# ----------------------------------------------------------------------------
# Tiny probe: pin pltpu.roll's rotation direction empirically so the conv tap
# shifts below are correct regardless of the convention used by the lowering.
# ----------------------------------------------------------------------------
def _roll_probe_kernel(x_ref, o_ref):
    o_ref[...] = pltpu.roll(x_ref[...], 1, axis=1)


def _detect_roll_sign():
    x = jax.lax.broadcasted_iota(jnp.int32, (8, 128), 1)
    out = pl.pallas_call(
        _roll_probe_kernel,
        out_shape=jax.ShapeDtypeStruct((8, 128), jnp.int32),
    )(x)
    v = int(jax.device_get(out)[0, 0])
    if v == 127:        # np.roll convention: out[i] = x[i - shift]
        return -1
    if v == 1:          # opposite convention: out[i] = x[i + shift]
        return 1
    raise RuntimeError(f"unexpected pltpu.roll probe result: {v}")


# ----------------------------------------------------------------------------
# Fully fused kernel: one grid step per batch element.
# All activations live in (C, H*W) layout (channels on sublanes, H*W on lanes).
# ----------------------------------------------------------------------------
def _multi_conv2d_kernel(
    x_ref,
    w_big_ref, aux_abc_ref, b_res_ref,
    w_b2_ref, aux_b2_ref,
    w_a2b3_ref, aux_ab23_ref,
    out_ref,
    xcol_ref, bcol_ref, ab_ref,
    *, H, W, mid, F, roll_sign,
):
    HW = H * W
    x = x_ref[0]                                        # (Cin, HW) f32

    # Flattened output coordinates; used to mask the 'same'-padding halo.
    lane = jax.lax.broadcasted_iota(jnp.int32, (1, HW), 1)
    yy = lane // W
    xx = lane - yy * W

    def shifted_tap(a, dy, dx):
        """a shifted so position (y,x) reads pixel (y+dy, x+dx); 0 outside."""
        off = dy * W + dx
        sh = a if off == 0 else pltpu.roll(a, (roll_sign * off) % HW, axis=1)
        ok = ((yy + dy >= 0) & (yy + dy < H) &
              (xx + dx >= 0) & (xx + dx < W))
        return jnp.where(ok, sh, 0.0)

    def build_im2col(a, col_ref, KH, KW):
        """Fill col_ref (KH*KW*C, HW) with the 'same'-padded im2col patches."""
        c = a.shape[0]
        ph, pw = KH // 2, KW // 2
        t = 0
        for kh in range(KH):
            for kw in range(KW):
                col_ref[t * c:(t + 1) * c, :] = shifted_tap(a, kh - ph, kw - pw)
                t += 1

    def mxu(w_ref, act):
        # bf16 x bf16 -> f32 accumulation on the MXU.
        return jnp.dot(w_ref[...], act.astype(jnp.bfloat16),
                       preferred_element_type=jnp.float32)

    def bias_relu_bn(acc, aux_ref):
        # aux_ref = [conv bias, folded BN scale, folded BN shift], each (C, 1).
        return jnp.maximum(acc + aux_ref[0], 0.0) * aux_ref[1] + aux_ref[2]

    # ---- matmul 1: shared 7x7 im2col of x feeds a1, b1, c1 AND res ----------
    build_im2col(x, xcol_ref, 7, 7)                     # (49*Cin, HW)
    big = mxu(w_big_ref, xcol_ref[...])                 # (2*mid+4F, HW) f32
    abc = bias_relu_bn(big[0:2 * mid + F, :], aux_abc_ref)
    a_act = abc[0:mid, :]                               # a1 activation
    b_act = abc[mid:2 * mid, :]                         # b1 activation
    c_out = abc[2 * mid:2 * mid + F, :]                 # finished branch c
    res = big[2 * mid + F:2 * mid + 4 * F, :] + b_res_ref[...]   # (3F, HW)

    # Stage a_act for the fused (a2 | b3) matmul.
    ab_ref[0:mid, :] = a_act

    # ---- matmul 2: branch-b 3x3 conv ----------------------------------------
    build_im2col(b_act, bcol_ref, 3, 3)                 # (9*mid, HW)
    b2 = bias_relu_bn(mxu(w_b2_ref, bcol_ref[...]), aux_b2_ref)   # (F, HW)
    ab_ref[mid:mid + F, :] = b2

    # ---- matmul 3: block-diagonal fusion of a2 (1x1) and b3 (1x1) -----------
    ab_out = bias_relu_bn(mxu(w_a2b3_ref, ab_ref[...]), aux_ab23_ref)  # (2F,HW)

    # ---- concat(a, b, c) + residual, written straight into NCHW output ------
    out_ref[0, 0:2 * F, :] = ab_out + res[0:2 * F, :]
    out_ref[0, 2 * F:3 * F, :] = c_out + res[2 * F:3 * F, :]


# ----------------------------------------------------------------------------
# Wrapper
# ----------------------------------------------------------------------------
def multi_conv2d_new_forward(x_nchw, packed, roll_sign):
    """x_nchw: (N, Cin, H, W) f32 -> (N, 3*num_filters, H, W) f32 (NCHW)."""
    N, Cin, H, W = x_nchw.shape
    HW = H * W
    F = packed["b_res"].shape[0] // 3
    mid = packed["w_a2b3"].shape[1] - F

    x = x_nchw.reshape(N, Cin, HW).astype(jnp.float32)

    operands = [
        x,
        packed["w_big"], packed["aux_abc"], packed["b_res"],
        packed["w_b2"], packed["aux_b2"],
        packed["w_a2b3"], packed["aux_ab23"],
    ]

    def _full(a):
        return pl.BlockSpec(a.shape, lambda n: (0,) * a.ndim)

    in_specs = [pl.BlockSpec((1, Cin, HW), lambda n: (n, 0, 0))]
    in_specs += [_full(a) for a in operands[1:]]

    kernel = functools.partial(_multi_conv2d_kernel,
                               H=H, W=W, mid=mid, F=F, roll_sign=roll_sign)

    out = pl.pallas_call(
        kernel,
        out_shape=jax.ShapeDtypeStruct((N, 3 * F, HW), jnp.float32),
        grid=(N,),
        in_specs=in_specs,
        out_specs=pl.BlockSpec((1, 3 * F, HW), lambda n: (n, 0, 0)),
        scratch_shapes=[
            pltpu.VMEM((49 * Cin, HW), jnp.float32),    # im2col of x (7x7 taps)
            pltpu.VMEM((9 * mid, HW), jnp.float32),     # im2col of branch-b act
            pltpu.VMEM((mid + F, HW), jnp.float32),     # stacked [a_act ; b2]
        ],
        compiler_params=pltpu.CompilerParams(
            dimension_semantics=("parallel",)),
    )(*operands)

    return out.reshape(N, 3 * F, H, W)      # already NCHW — no transpose


# ----------------------------------------------------------------------------
# Parameter construction (deterministic, synthetic, PyTorch OIHW layouts)
# ----------------------------------------------------------------------------
def _make_conv(key, cout, cin, kh, kw):
    k1, k2 = jax.random.split(key)
    w = 0.1 * jax.random.normal(k1, (cout, cin, kh, kw), jnp.float32)
    b = 0.1 * jax.random.normal(k2, (cout,), jnp.float32)
    return w, b


def _make_bn(key, c):
    k1, k2 = jax.random.split(key)
    gamma = 1.0 + 0.1 * jax.random.normal(k1, (c,), jnp.float32)
    beta = 0.1 * jax.random.normal(k2, (c,), jnp.float32)
    running_mean = jnp.zeros((c,), jnp.float32)
    running_var = jnp.ones((c,), jnp.float32)
    scale = gamma / jnp.sqrt(running_var + _BN_EPS)
    shift = beta - running_mean * scale
    return scale, shift


def init_params(key, in_filters, num_filters):
    mid = int(num_filters / 1.5)
    keys = jax.random.split(key, 13)
    p = {}
    p["a1"] = _make_conv(keys[0], mid, in_filters, 3, 3) + _make_bn(keys[1], mid)
    p["a2"] = _make_conv(keys[2], num_filters, mid, 1, 1) + _make_bn(keys[3], num_filters)
    p["b1"] = _make_conv(keys[4], mid, in_filters, 7, 7) + _make_bn(keys[5], mid)
    p["b2"] = _make_conv(keys[6], num_filters, mid, 3, 3) + _make_bn(keys[7], num_filters)
    p["b3"] = _make_conv(keys[8], num_filters, num_filters, 1, 1) + _make_bn(keys[9], num_filters)
    p["c1"] = _make_conv(keys[10], num_filters, in_filters, 1, 1) + _make_bn(keys[11], num_filters)
    p["res"] = _make_conv(keys[12], num_filters * 3, in_filters, 1, 1)
    return p


def _to_matrix(w):
    """(Cout, Cin, KH, KW) -> (Cout, KH*KW*Cin), rows ordered tap-major to
    match the kernel's im2col layout."""
    cout, cin, kh, kw = w.shape
    return jnp.transpose(w, (0, 2, 3, 1)).reshape(cout, kh * kw * cin)


def pack_params(params):
    """Fold the module parameters into the fused kernel's operand set."""
    wa1, ba1, sa1, ta1 = params["a1"]
    wa2, ba2, sa2, ta2 = params["a2"]
    wb1, bb1, sb1, tb1 = params["b1"]
    wb2, bb2, sb2, tb2 = params["b2"]
    wb3, bb3, sb3, tb3 = params["b3"]
    wc1, bc1, sc1, tc1 = params["c1"]
    wr, br = params["res"]

    mid = wa1.shape[0]
    F = wa2.shape[0]

    def embed7(w):
        """Zero-embed a KxK (K<=7) conv into the 7x7 tap grid (center-aligned)."""
        kh, kw = w.shape[2], w.shape[3]
        ph, pw = (7 - kh) // 2, (7 - kw) // 2
        return jnp.pad(w, ((0, 0), (0, 0), (ph, ph), (pw, pw)))

    # Matmul 1: [a1 | b1 | c1 | res] all over the single shared 7x7 im2col of x.
    w_big = jnp.concatenate(
        [_to_matrix(embed7(wa1)), _to_matrix(wb1),
         _to_matrix(embed7(wc1)), _to_matrix(embed7(wr))], axis=0)

    def aux(bs, ss, ts):
        b = jnp.concatenate(bs)
        s = jnp.concatenate(ss)
        t = jnp.concatenate(ts)
        return jnp.stack([b, s, t]).astype(jnp.float32)[:, :, None]  # (3,C,1)

    aux_abc = aux([ba1, bb1, bc1], [sa1, sb1, sc1], [ta1, tb1, tc1])

    # Matmul 3: block-diagonal [a2 ; b3] acting on rows [a_act ; b2_act].
    m_a2 = _to_matrix(wa2)                          # (F, mid)
    m_b3 = _to_matrix(wb3)                          # (F, F)
    top = jnp.concatenate([m_a2, jnp.zeros((F, F), jnp.float32)], axis=1)
    bot = jnp.concatenate([jnp.zeros((F, mid), jnp.float32), m_b3], axis=1)
    w_a2b3 = jnp.concatenate([top, bot], axis=0)    # (2F, mid+F)
    aux_ab23 = aux([ba2, bb3], [sa2, sb3], [ta2, tb3])

    bf16 = jnp.bfloat16
    return {
        "w_big": w_big.astype(bf16),
        "aux_abc": aux_abc,
        "b_res": br.astype(jnp.float32)[:, None],               # (3F, 1)
        "w_b2": _to_matrix(wb2).astype(bf16),
        "aux_b2": aux([bb2], [sb2], [tb2]),
        "w_a2b3": w_a2b3.astype(bf16),
        "aux_ab23": aux_ab23,
    }


# ----------------------------------------------------------------------------
# Pure-JAX reference (mirrors the PyTorch forward, eval-mode BN)
# ----------------------------------------------------------------------------
def _conv_same_ref(x, w, b):
    y = jax.lax.conv_general_dilated(
        x, w, window_strides=(1, 1), padding="SAME",
        dimension_numbers=("NCHW", "OIHW", "NCHW"))
    return y + b[None, :, None, None]


def _block_ref(x, w, b, scale, shift):
    y = jnp.maximum(_conv_same_ref(x, w, b), 0.0)
    return y * scale[None, :, None, None] + shift[None, :, None, None]


def reference_forward(x, params):
    a = _block_ref(x, *params["a1"])
    a = _block_ref(a, *params["a2"])
    b = _block_ref(x, *params["b1"])
    b = _block_ref(b, *params["b2"])
    b = _block_ref(b, *params["b3"])
    c = _block_ref(x, *params["c1"])
    r = _conv_same_ref(x, *params["res"])
    return jnp.concatenate([a, b, c], axis=1) + r


# ----------------------------------------------------------------------------
if __name__ == "__main__":
    in_filters, num_filters = 4, 12      # mid = int(12 / 1.5) = 8
    N, H, W = 2, 16, 16

    key = jax.random.PRNGKey(0)
    kx, kp = jax.random.split(key)
    x = jax.random.normal(kx, (N, in_filters, H, W), jnp.float32)    # NCHW
    params = init_params(kp, in_filters, num_filters)
    packed = pack_params(params)

    roll_sign = _detect_roll_sign()

    fwd = jax.jit(multi_conv2d_new_forward, static_argnames=("roll_sign",))
    out = jax.block_until_ready(fwd(x, packed, roll_sign=roll_sign))

    assert out.shape == (N, num_filters * 3, H, W), out.shape

    # Correctness check against a pure-JAX reference (tolerance covers bf16 MXU).
    ref = jax.block_until_ready(jax.jit(reference_forward)(x, params))
    np.testing.assert_allclose(np.asarray(out), np.asarray(ref),
                               rtol=5e-2, atol=5e-2)

    print("KERNEL_OK")
</pallas_src>

<mosaic_0001>
module attributes {stable_mosaic.version = 11 : i64} {
  func.func @_roll_probe_kernel(%arg0: memref<8x128xi32, #tpu.memory_space<vmem>>, %arg1: memref<8x128xi32, #tpu.memory_space<vmem>>) attributes {dimension_semantics = [], scalar_prefetch = 0 : i64, scratch_operands = 0 : i64, tpu.core_type = #tpu.core_type<tc>} {
    %c0 = arith.constant 0 : index
    %c0_0 = arith.constant 0 : index
    %0 = vector.load %arg0[%c0, %c0_0] : memref<8x128xi32, #tpu.memory_space<vmem>>, vector<8x128xi32>
    %c1_i32 = arith.constant 1 : i32
    %1 = tpu.dynamic_rotate %0 by %c1_i32 dim 1 : vector<8x128xi32>, i32 -> vector<8x128xi32>
    %c0_1 = arith.constant 0 : index
    %c0_2 = arith.constant 0 : index
    %2 = vector.load %arg1[%c0_1, %c0_2] : memref<8x128xi32, #tpu.memory_space<vmem>>, vector<8x128xi32>
    tpu.vector_store %arg1[%c0_1, %c0_2], %1 {strides = array<i32>} : memref<8x128xi32, #tpu.memory_space<vmem>>, vector<8x128xi32>,
    return
  }
}

</mosaic_0001>

<bundles_post_ra>
// kernel: tpu_custom_call.1
= control target key start
LH: loop header
LB: loop body
LE: loop exit
PB: predicated region body
PF: predicated region fallthrough
CT: control target
= control target key end

     0   :  { %6 = vsyncpa [#allocation3], 0  ;;  %s118_s0 = inlined_call_operand.hbm [shape: s32[8,128], index: 0, kind: input, shape index: {}]   ;;  %s119_s1 = inlined_call_operand.hbm [shape: s32[8,128], index: 1, kind: output, shape index: {}]  }
   0x1   :  { %7 = vsyncpa [#allocation4], 0  ;;  %s13_s8 = sshll.u32 %s118_s0, 4  ;;  %s99_s9 = smov [#allocation2]   ;;  %s14_s8 = int_to_ptr.hbm [resolvable:$true] %s13_s8 }
   0x2   :  { %s15_s10 = sshll.u32 %s99_s9, 4  ;;  %s16_s10 = int_to_ptr.vmem [resolvable:$true] %s15_s10 }
   0x3   :  { %18 = dma.hbm_to_vmem [thread:$0]  %s14_s8, 128, %s16_s10, [#allocation3]  }
   0x4   :  { %95 = dma.done.wait [#allocation3], 128  }
   0x5   :  { %96 = vsyncadd [#allocation3], 4294967168  ;;  %v23_v0 = vld [vmem:[#allocation2] sm:$0xff]  ;;  %s100_s11 = smov 1   ;;  %s101_s12 = smov [#allocation5]  }
   0x6   :  { %24 = vrot.lane.b32.xlu0 %v23_v0, %s100_s11  ;;  %s32_s13 = sshll.u32 %s101_s12, 4  ;;  %s34_s16 = sshll.u32 %s119_s1, 4  ;;  %s33_s13 = int_to_ptr.vmem [resolvable:$true] %s32_s13  ;;  %s35_s16 = int_to_ptr.hbm [resolvable:$true] %s34_s16 }
  0x78   :  { %v25_v1 = vpop.permute.xlu0 %24 }
  0x79   :  { %26 = vst [vmem:[#allocation5] sm:$0xff] %v25_v1 }
  0x7a   :  { %37 = dma.vmem_to_hbm [thread:$0]  %s33_s13, 128, %s35_s16, [#allocation4]  }
  0x7b   :  { %97 = dma.done.wait [#allocation4], 128  }
  0x7c   :  { %98 = vsyncadd [#allocation4], 4294967168 }
  0x7d   :  { %42 = vsyncpa [#allocation3], 1 }
  0x7e   :  { %43 = vsyncpa [#allocation4], 1 }

</bundles_post_ra>
